<compile_context>
chip_gen: v5e
topology: v5e:2x2
jax: 0.10.0
libtpu: 0.0.40
codegen_flags: <defaults>
</compile_context>

<pallas_src>
import functools

import jax
import jax.numpy as jnp
from jax.experimental import pallas as pl
from jax.experimental.pallas import tpu as pltpu

LANE = 128  # TPU lane width; all feature-like dims are padded to this.


def gnn_kernel(a_ref, x_ref, w1_ref, w2_ref, out_ref, *,
               hidden_dim, num_classes, compute_dtype):
    cd = compute_dtype
    a = a_ref[...].astype(cd)            # [N, N]   row-normalized adjacency
    x = x_ref[...]                       # [N, FP]  padded features, ones col at lane F

    # ---- SAGEConv layer 1 + ReLU (fused projection, bias folded into w1) ----
    agg1 = jnp.dot(a, x.astype(cd), preferred_element_type=jnp.float32)    # [N, FP]
    cat1 = jnp.concatenate([agg1, x], axis=1).astype(cd)                   # [N, 2*FP]
    h1 = jnp.dot(cat1, w1_ref[...], preferred_element_type=jnp.float32)    # [N, HP]
    h1 = jnp.maximum(h1, 0.0)            # padded lanes of h1 stay exactly 0

    # ---- SAGEConv layer 2 + ReLU ----
    agg2 = jnp.dot(a, h1.astype(cd), preferred_element_type=jnp.float32)   # [N, HP]
    # Put a 1.0 in padded lane `hidden_dim` of the root copy of h1; it hits the
    # bias row of the fused w2 so the bias rides the same MXU pass.
    lane_h = jax.lax.broadcasted_iota(jnp.int32, h1.shape, 1)
    h1_root = h1 + (lane_h == hidden_dim).astype(jnp.float32)
    cat2 = jnp.concatenate([agg2, h1_root], axis=1).astype(cd)             # [N, 2*HP]
    h2 = jnp.dot(cat2, w2_ref[...], preferred_element_type=jnp.float32)    # [N, CP]
    h2 = jnp.maximum(h2, 0.0)

    # ---- log_softmax over the real class lanes only (padded lanes masked) ----
    lane_c = jax.lax.broadcasted_iota(jnp.int32, h2.shape, 1)
    valid = lane_c < num_classes
    z = jnp.where(valid, h2, -1e30)
    m = jnp.max(z, axis=1, keepdims=True)
    s = z - m
    lse = jnp.log(jnp.sum(jnp.exp(s), axis=1, keepdims=True))
    out_ref[...] = jnp.where(valid, s - lse, 0.0)                          # lane-dense store


def fuse_and_pad_params(w1l, w1r, b1, w2l, w2r, b2, *,
                        feat_pad=LANE, hidden_pad=LANE, class_pad=LANE,
                        compute_dtype=jnp.float32):
    """Stack [lin_l; lin_r] per layer, pad to 128 lanes, fold bias into an extra row."""
    f_in, h = w1l.shape
    h_chk, c = w2l.shape
    assert h_chk == h and f_in < feat_pad and h < hidden_pad and c <= class_pad

    w1 = jnp.zeros((2 * feat_pad, hidden_pad), jnp.float32)
    w1 = w1.at[:f_in, :h].set(w1l)                         # lin_l block (acts on agg)
    w1 = w1.at[feat_pad:feat_pad + f_in, :h].set(w1r)      # lin_r block (acts on x)
    w1 = w1.at[feat_pad + f_in, :h].set(b1.reshape(-1))    # bias row (hit by ones lane F)

    w2 = jnp.zeros((2 * hidden_pad, class_pad), jnp.float32)
    w2 = w2.at[:h, :c].set(w2l)
    w2 = w2.at[hidden_pad:hidden_pad + h, :c].set(w2r)
    w2 = w2.at[hidden_pad + h, :c].set(b2.reshape(-1))     # bias row (hit by ones lane H)
    return w1.astype(compute_dtype), w2.astype(compute_dtype)


def pad_features(x, feat_pad=LANE):
    n, f_in = x.shape
    x_pad = jnp.zeros((n, feat_pad), jnp.float32)
    x_pad = x_pad.at[:, :f_in].set(x)
    x_pad = x_pad.at[:, f_in].set(1.0)      # ones lane -> bias row of fused w1
    return x_pad


def gnn_forward(a, x_pad, w1, w2, *, hidden_dim, num_classes,
                compute_dtype=jnp.float32):
    n = x_pad.shape[0]
    class_pad = w2.shape[1]
    vmem = pl.BlockSpec(memory_space=pltpu.MemorySpace.VMEM)
    kernel = functools.partial(gnn_kernel, hidden_dim=hidden_dim,
                               num_classes=num_classes, compute_dtype=compute_dtype)
    out_pad = pl.pallas_call(
        kernel,
        out_shape=jax.ShapeDtypeStruct((n, class_pad), jnp.float32),
        in_specs=[vmem] * 4,
        out_specs=vmem,
    )(a, x_pad, w1, w2)
    return out_pad[:, :num_classes]         # drop padded class lanes (wrapper glue)


def reference_forward(a, x, w1l, w1r, b1, w2l, w2r, b2):
    h1 = jax.nn.relu(a @ x @ w1l + x @ w1r + b1)
    h2 = jax.nn.relu(a @ h1 @ w2l + h1 @ w2r + b2)
    return jax.nn.log_softmax(h2, axis=1)


if __name__ == "__main__":
    N, F, H, C = 64, 32, 16, 3          # nodes, num_features, hidden=16, classes=len(['30','60','90'])
    NUM_EDGES = 256

    key = jax.random.PRNGKey(0)
    kx, ks, kd, k1, k2, k3, k4, k5, k6 = jax.random.split(key, 9)

    # Node features and a deterministic random edge_index [2, NUM_EDGES].
    x = jax.random.normal(kx, (N, F), dtype=jnp.float32)
    src = jax.random.randint(ks, (NUM_EDGES,), 0, N)
    dst = jax.random.randint(kd, (NUM_EDGES,), 0, N)

    # Dense row-normalized adjacency (glue in plain JAX).
    counts = jnp.zeros((N, N), jnp.float32).at[dst, src].add(1.0)
    deg = jnp.sum(counts, axis=1, keepdims=True)
    a = jnp.where(deg > 0, counts / jnp.maximum(deg, 1.0), 0.0)

    # Deterministic parameter init (shapes from SAGEConv(F,16), SAGEConv(16,3)).
    w1l = jax.random.normal(k1, (F, H), dtype=jnp.float32) * (1.0 / jnp.sqrt(F))
    w1r = jax.random.normal(k2, (F, H), dtype=jnp.float32) * (1.0 / jnp.sqrt(F))
    b1 = 0.1 * jax.random.normal(k5, (H,), dtype=jnp.float32)
    w2l = jax.random.normal(k3, (H, C), dtype=jnp.float32) * (1.0 / jnp.sqrt(H))
    w2r = jax.random.normal(k4, (H, C), dtype=jnp.float32) * (1.0 / jnp.sqrt(H))
    b2 = 0.1 * jax.random.normal(k6, (C,), dtype=jnp.float32)

    x_pad = pad_features(x)

    # --- f32 path (exact check vs. unfused JAX reference; also the v5e path) ---
    w1f, w2f = fuse_and_pad_params(w1l, w1r, b1, w2l, w2r, b2)
    out = gnn_forward(a, x_pad, w1f, w2f, hidden_dim=H, num_classes=C)
    out = jax.block_until_ready(out)
    ref = reference_forward(a, x, w1l, w1r, b1, w2l, w2r, b2)
    assert out.shape == (N, C)
    assert jnp.allclose(out, ref, atol=1e-4, rtol=1e-4), "mismatch vs JAX reference"

    # --- bf16-input / f32-accumulate path (v6e / v7x MXU); smoke-checked ---
    w1b, w2b = fuse_and_pad_params(w1l, w1r, b1, w2l, w2r, b2,
                                   compute_dtype=jnp.bfloat16)
    out_bf16 = gnn_forward(a, x_pad, w1b, w2b, hidden_dim=H, num_classes=C,
                           compute_dtype=jnp.bfloat16)
    out_bf16 = jax.block_until_ready(out_bf16)
    assert out_bf16.shape == (N, C)
    assert bool(jnp.all(jnp.isfinite(out_bf16)))

    print("KERNEL_OK")
</pallas_src>

<mosaic_0001>
module attributes {stable_mosaic.version = 11 : i64} {
  func.func @gnn_kernel(%arg0: memref<64x64xf32, #tpu.memory_space<vmem>>, %arg1: memref<64x128xf32, #tpu.memory_space<vmem>>, %arg2: memref<256x128xf32, #tpu.memory_space<vmem>>, %arg3: memref<256x128xf32, #tpu.memory_space<vmem>>, %arg4: memref<64x128xf32, #tpu.memory_space<vmem>>) attributes {dimension_semantics = [], scalar_prefetch = 0 : i64, scratch_operands = 0 : i64, tpu.core_type = #tpu.core_type<tc>} {
    %c0 = arith.constant 0 : index
    %c0_0 = arith.constant 0 : index
    %0 = vector.load %arg0[%c0, %c0_0] : memref<64x64xf32, #tpu.memory_space<vmem>>, vector<64x64xf32>
    %c0_1 = arith.constant 0 : index
    %c0_2 = arith.constant 0 : index
    %1 = vector.load %arg1[%c0_1, %c0_2] : memref<64x128xf32, #tpu.memory_space<vmem>>, vector<64x128xf32>
    %cst = arith.constant dense<0.000000e+00> : vector<64x128xf32>
    %2 = tpu.matmul %0, %1, %cst {dimension_numbers = #tpu.dot_dimension_numbers<[1], [0], [0], [1], [0, 0, 1, 1], [], []>} : vector<64x64xf32>, vector<64x128xf32>, vector<64x128xf32> -> vector<64x128xf32>
    %3 = tpu.concatenate %2, %1 in 1 : vector<64x128xf32>, vector<64x128xf32> -> vector<64x256xf32>
    %c0_3 = arith.constant 0 : index
    %c0_4 = arith.constant 0 : index
    %4 = vector.load %arg2[%c0_3, %c0_4] : memref<256x128xf32, #tpu.memory_space<vmem>>, vector<256x128xf32>
    %cst_5 = arith.constant dense<0.000000e+00> : vector<64x128xf32>
    %5 = tpu.matmul %3, %4, %cst_5 {dimension_numbers = #tpu.dot_dimension_numbers<[1], [0], [0], [1], [0, 0, 1, 1], [], []>} : vector<64x256xf32>, vector<256x128xf32>, vector<64x128xf32> -> vector<64x128xf32>
    %cst_6 = arith.constant 0.000000e+00 : f32
    %6 = vector.broadcast %cst_6 : f32 to vector<64x128xf32>
    %7 = arith.maximumf %5, %6 : vector<64x128xf32>
    %cst_7 = arith.constant dense<0.000000e+00> : vector<64x128xf32>
    %8 = tpu.matmul %0, %7, %cst_7 {dimension_numbers = #tpu.dot_dimension_numbers<[1], [0], [0], [1], [0, 0, 1, 1], [], []>} : vector<64x64xf32>, vector<64x128xf32>, vector<64x128xf32> -> vector<64x128xf32>
    %9 = tpu.iota {dimensions = array<i32: 1>} : vector<64x128xi32>
    %c16_i32 = arith.constant 16 : i32
    %10 = vector.broadcast %c16_i32 : i32 to vector<64x128xi32>
    %11 = arith.cmpi eq, %9, %10 : vector<64x128xi32>
    %12 = arith.extui %11 : vector<64x128xi1> to vector<64x128xi32>
    %13 = arith.sitofp %12 : vector<64x128xi32> to vector<64x128xf32>
    %14 = arith.addf %7, %13 : vector<64x128xf32>
    %15 = tpu.concatenate %8, %14 in 1 : vector<64x128xf32>, vector<64x128xf32> -> vector<64x256xf32>
    %c0_8 = arith.constant 0 : index
    %c0_9 = arith.constant 0 : index
    %16 = vector.load %arg3[%c0_8, %c0_9] : memref<256x128xf32, #tpu.memory_space<vmem>>, vector<256x128xf32>
    %cst_10 = arith.constant dense<0.000000e+00> : vector<64x128xf32>
    %17 = tpu.matmul %15, %16, %cst_10 {dimension_numbers = #tpu.dot_dimension_numbers<[1], [0], [0], [1], [0, 0, 1, 1], [], []>} : vector<64x256xf32>, vector<256x128xf32>, vector<64x128xf32> -> vector<64x128xf32>
    %cst_11 = arith.constant 0.000000e+00 : f32
    %18 = vector.broadcast %cst_11 : f32 to vector<64x128xf32>
    %19 = arith.maximumf %17, %18 : vector<64x128xf32>
    %20 = tpu.iota {dimensions = array<i32: 1>} : vector<64x128xi32>
    %c3_i32 = arith.constant 3 : i32
    %21 = vector.broadcast %c3_i32 : i32 to vector<64x128xi32>
    %22 = arith.cmpi slt, %20, %21 : vector<64x128xi32>
    %cst_12 = arith.constant -1.000000e+30 : f32
    %23 = vector.broadcast %cst_12 : f32 to vector<64x128xf32>
    %24 = arith.select %22, %19, %23 : vector<64x128xi1>, vector<64x128xf32>
    %cst_13 = arith.constant dense<0xFF800000> : vector<64xf32>
    %25 = vector.multi_reduction <maximumf>, %24, %cst_13 [1] : vector<64x128xf32> to vector<64xf32>
    %26 = vector.shape_cast %25 : vector<64xf32> to vector<64x1xf32>
    %27 = vector.broadcast %26 : vector<64x1xf32> to vector<64x128xf32>
    %28 = arith.subf %24, %27 : vector<64x128xf32>
    %29 = math.exp %28 : vector<64x128xf32>
    %cst_14 = arith.constant dense<0.000000e+00> : vector<64xf32>
    %30 = vector.multi_reduction <add>, %29, %cst_14 [1] : vector<64x128xf32> to vector<64xf32>
    %31 = vector.shape_cast %30 : vector<64xf32> to vector<64x1xf32>
    %32 = math.log %31 : vector<64x1xf32>
    %33 = vector.broadcast %32 : vector<64x1xf32> to vector<64x128xf32>
    %34 = arith.subf %28, %33 : vector<64x128xf32>
    %cst_15 = arith.constant 0.000000e+00 : f32
    %35 = vector.broadcast %cst_15 : f32 to vector<64x128xf32>
    %36 = arith.select %22, %34, %35 : vector<64x128xi1>, vector<64x128xf32>
    %c0_16 = arith.constant 0 : index
    %c0_17 = arith.constant 0 : index
    %37 = vector.load %arg4[%c0_16, %c0_17] : memref<64x128xf32, #tpu.memory_space<vmem>>, vector<64x128xf32>
    tpu.vector_store %arg4[%c0_16, %c0_17], %36 {strides = array<i32>} : memref<64x128xf32, #tpu.memory_space<vmem>>, vector<64x128xf32>,
    return
  }
}

</mosaic_0001>

<bundles_post_ra>
// kernel: tpu_custom_call.1
= control target key start
LH: loop header
LB: loop body
LE: loop exit
PB: predicated region body
PF: predicated region fallthrough
CT: control target
= control target key end

     0   :  { %9 = vsyncpa [#allocation3], 0  ;;  %s1008_s0 = inlined_call_operand.hbm [shape: f32[64,64], index: 0, kind: input, shape index: {}]   ;;  %s1009_s1 = inlined_call_operand.hbm [shape: f32[64,128], index: 1, kind: input, shape index: {}]   ;;  %s1010_s2 = inlined_call_operand.hbm [shape: f32[256,128], index: 2, kind: input, shape index: {}]   ;;  %s1011_s3 = inlined_call_operand.hbm [shape: f32[256,128], index: 3, kind: input, shape index: {}]   ;;  %s1012_s4 = inlined_call_operand.hbm [shape: f32[64,128], index: 4, kind: output, shape index: {}]  }
   0x1   :  { %10 = vsyncpa [#allocation6], 0 }
   0x2   :  { %11 = vsyncpa [#allocation9], 0 }
   0x3   :  { %12 = vsyncpa [#allocation4], 0  ;;  %s30_s17 = sshll.u32 %s1009_s1, 4  ;;  %s788_s18 = smov [#allocation5]   ;;  %s31_s17 = int_to_ptr.hbm [resolvable:$true] %s30_s17 }
   0x4   :  { %s32_s19 = sshll.u32 %s788_s18, 4  ;;  %s17_s22 = sshll.u32 %s1008_s0, 4  ;;  %s33_s19 = int_to_ptr.vmem [resolvable:$true] %s32_s19  ;;  %s18_s22 = int_to_ptr.hbm [resolvable:$true] %s17_s22 }
   0x5   :  { %s789_s23 = smov 128   ;;  %s790_s24 = smov 8  }
   0x6   :  { %38 = dma.hbm_to_vmem [thread:$0]  %s31_s17, 1024, %s33_s19, [#allocation6], %s789_s23, %s789_s23, %s790_s24  }
   0x7   :  { %s791_s25 = smov [#allocation2]   ;;  %s43_s1 = sshll.u32 %s1010_s2, 4  ;;  %s44_s1 = int_to_ptr.hbm [resolvable:$true] %s43_s1 }
   0x8   :  { %s19_s26 = sshll.u32 %s791_s25, 4  ;;  %s56_s30 = sshll.u32 %s1011_s3, 4  ;;  %s20_s26 = int_to_ptr.vmem [resolvable:$true] %s19_s26  ;;  %s57_s30 = int_to_ptr.hbm [resolvable:$true] %s56_s30 }
   0x9   :  { %25 = dma.hbm_to_vmem [thread:$0]  %s18_s22, 1024, %s20_s26, [#allocation3], %s789_s23, %s789_s23, %s790_s24  }
   0xa   :  { %s792_s5 = smov [#allocation7]   ;;  %s793_s7 = smov [#allocation8]  }
   0xb   :  { %s45_s6 = sshll.u32 %s792_s5, 4  ;;  %s58_s2 = sshll.u32 %s793_s7, 4  ;;  %s46_s6 = int_to_ptr.vmem [resolvable:$true] %s45_s6  ;;  %s59_s2 = int_to_ptr.vmem [resolvable:$true] %s58_s2 }
   0xc   :  { %51 = dma.hbm_to_vmem [thread:$0]  %s44_s1, 4096, %s46_s6, [#allocation6], %s789_s23, %s789_s23, %s790_s24  }
   0xd   :  { %64 = dma.hbm_to_vmem [thread:$0]  %s57_s30, 4096, %s59_s2, [#allocation9], %s789_s23, %s789_s23, %s790_s24  }
   0xe   :  { %780 = dma.done.wait [#allocation3], 1024  }
   0xf   :  { %781 = vsyncadd [#allocation3], 4294966272 }
  0x10   :  { %782 = dma.done.wait [#allocation6], 5120  }
  0x11   :  { %783 = vsyncadd [#allocation6], 4294962176 }
  0x12   :  { %784 = dma.done.wait [#allocation9], 4096  }
  0x13   :  { %785 = vsyncadd [#allocation9], 4294963200  ;;  %v845_v0 = vld [vmem:[#allocation5 + $0x38] sm:$0xff]  ;;  %v847_v1 = vld [vmem:[#allocation5 + $0x30] sm:$0xff]  ;;  %vm97_vm0 = vcmask 523264   ;;  %s795_s3 = smov [#allocation10]  }
  0x14   :  { %130 = vmatpush.msra.mxu0 %v845_v0  ;;  %604 = vmatpush.msra.mxu1 %v845_v0  ;;  %v851_v2 = vld [vmem:[#allocation5 + $0x28] sm:$0xff]  ;;  %v855_v3 = vld [vmem:[#allocation5 + $0x20] sm:$0xff]  ;;  %v859_v4 = vld [vmem:[#allocation5 + $0x18] sm:$0xff]  ;;  %s570_s8 = sshll.u32 %s795_s3, 4  ;;  %s572_s11 = sshll.u32 %s1012_s4, 4  ;;  %s571_s8 = int_to_ptr.vmem [resolvable:$true] %s570_s8  ;;  %s573_s11 = int_to_ptr.hbm [resolvable:$true] %s572_s11 }
  0x15   :  { %v863_v5 = vld [vmem:[#allocation5 + $0x10] sm:$0xff]  ;;  %v194_v6 = vld [vmem:[#allocation7 + $0xf8] sm:$0xff]  ;;  %v867_v8 = vld [vmem:[#allocation5 + $0x8] sm:$0xff] }
  0x16   :  { %131 = vmatpush.msra.mxu0 %v847_v1  ;;  %605 = vmatpush.msra.mxu1 %v847_v1  ;;  %v193_v7 = vld [vmem:[#allocation7 + $0xf0] sm:$0xff]  ;;  %v192_v9 = vld [vmem:[#allocation7 + $0xe8] sm:$0xff]  ;;  %v871_v10 = vld [vmem:[#allocation5] sm:$0xff] }
  0x17   :  { %236 = vmatpush.msra.mxu2 %v194_v6  ;;  %v874_v11 = vld [vmem:[#allocation2] sm:$0xff]  ;;  %v178_v13 = vld [vmem:[#allocation7 + $0x78] sm:$0xff]  ;;  %v177_v15 = vld [vmem:[#allocation7 + $0x70] sm:$0xff] }
  0x18   :  { %132 = vmatpush.msra.mxu0 %v851_v2  ;;  %606 = vmatpush.msra.mxu1 %v851_v2  ;;  %v877_v12 = vld [vmem:[#allocation2 + $0x20] sm:$0xff]  ;;  %v190_v16 = vld [vmem:[#allocation7 + $0xd8] sm:$0xff]  ;;  %v176_v17 = vld [vmem:[#allocation7 + $0x68] sm:$0xff] }
  0x19   :  { %237 = vmatpush.msra.mxu2 %v193_v7  ;;  %v191_v14 = vld [vmem:[#allocation7 + $0xe0] sm:$0xff]  ;;  %v189_v18 = vld [vmem:[#allocation7 + $0xd0] sm:$0xff]  ;;  %v188_v20 = vld [vmem:[#allocation7 + $0xc8] sm:$0xff] }
  0x1a   :  { %133 = vmatpush.msra.mxu0 %v855_v3  ;;  %607 = vmatpush.msra.mxu1 %v855_v3  ;;  %v175_v19 = vld [vmem:[#allocation7 + $0x60] sm:$0xff]  ;;  %v885_v21 = vld [vmem:[#allocation2 + $0x8] sm:$0xff]  ;;  %v174_v23 = vld [vmem:[#allocation7 + $0x58] sm:$0xff] }
  0x1b   :  { %238 = vmatpush.msra.mxu2 %v192_v9  ;;  %v887_v22 = vld [vmem:[#allocation2 + $0x28] sm:$0xff]  ;;  %v187_v24 = vld [vmem:[#allocation7 + $0xc0] sm:$0xff]  ;;  %v173_v25 = vld [vmem:[#allocation7 + $0x50] sm:$0xff] }
  0x1c   :  { %134 = vmatpush.msra.mxu0 %v859_v4  ;;  %608 = vmatpush.msra.mxu1 %v859_v4  ;;  %v186_v26 = vld [vmem:[#allocation7 + $0xb8] sm:$0xff]  ;;  %v172_v27 = vld [vmem:[#allocation7 + $0x48] sm:$0xff]  ;;  %v185_v28 = vld [vmem:[#allocation7 + $0xb0] sm:$0xff] }
  0x1d   :  { %239 = vmatpush.msra.mxu2 %v191_v14  ;;  %v171_v29 = vld [vmem:[#allocation7 + $0x40] sm:$0xff]  ;;  %v184_v30 = vld [vmem:[#allocation7 + $0xa8] sm:$0xff]  ;;  %v893_v31 = vld [vmem:[#allocation2 + $0x10] sm:$0xff] }
  0x1e   :  { %135 = vmatpush.msra.mxu0 %v863_v5  ;;  %609 = vmatpush.msra.mxu1 %v863_v5  ;;  %v895_v32 = vld [vmem:[#allocation2 + $0x30] sm:$0xff]  ;;  %v170_v33 = vld [vmem:[#allocation7 + $0x38] sm:$0xff]  ;;  %v183_v34 = vld [vmem:[#allocation7 + $0xa0] sm:$0xff] }
  0x1f   :  { %240 = vmatpush.msra.mxu2 %v190_v16  ;;  %v169_v35 = vld [vmem:[#allocation7 + $0x30] sm:$0xff]  ;;  %v182_v36 = vld [vmem:[#allocation7 + $0x98] sm:$0xff]  ;;  %v168_v37 = vld [vmem:[#allocation7 + $0x28] sm:$0xff] }
  0x20   :  { %136 = vmatpush.msra.mxu0 %v867_v8  ;;  %610 = vmatpush.msra.mxu1 %v867_v8  ;;  %v181_v38 = vld [vmem:[#allocation7 + $0x90] sm:$0xff]  ;;  %v167_v39 = vld [vmem:[#allocation7 + $0x20] sm:$0xff]  ;;  %v180_v40 = vld [vmem:[#allocation7 + $0x88] sm:$0xff] }
  0x21   :  { %241 = vmatpush.msra.mxu2 %v189_v18  ;;  %v901_v41 = vld [vmem:[#allocation2 + $0x18] sm:$0xff]  ;;  %v179_v44 = vld [vmem:[#allocation7 + $0x80] sm:$0xff]  ;;  %v165_v45 = vld [vmem:[#allocation7 + $0x10] sm:$0xff] }
  0x22   :  { %137 = vmatpush.msra.mxu0 %v871_v10  ;;  %611 = vmatpush.msra.mxu1 %v871_v10  ;;  %v903_v42 = vld [vmem:[#allocation2 + $0x38] sm:$0xff]  ;;  %v164_v46 = vld [vmem:[#allocation7 + $0x8] sm:$0xff]  ;;  %v163_v47 = vld [vmem:[#allocation7] sm:$0xff] }
  0x23   :  { %587 = vmatmul.msk.f32.vlgmr.msra.gmra.mxu0 %vm97_vm0, %v874_v11  ;;  %591 = vmatmul.msk.f32.vlgmr.msra.gmra.mxu1 %vm97_vm0, %v877_v12  ;;  %v166_v43 = vld [vmem:[#allocation7 + $0x18] sm:$0xff] }
  0x24   :  { %195 = vmatpush.msrb.mxu1 %v178_v13  ;;  %242 = vmatpush.msra.mxu2 %v188_v20 }
  0x26   :  { %196 = vmatpush.msrb.mxu1 %v177_v15  ;;  %243 = vmatpush.msra.mxu2 %v187_v24 }
  0x28   :  { %197 = vmatpush.msrb.mxu1 %v176_v17  ;;  %244 = vmatpush.msra.mxu2 %v186_v26 }
  0x2a   :  { %198 = vmatpush.msrb.mxu1 %v175_v19  ;;  %245 = vmatpush.msra.mxu2 %v185_v28  ;;  %v370_v28 = vld [vmem:[#allocation8 + $0xf8] sm:$0xff] }
  0x2b   :  { %588 = vmatmul.msk.f32.gmra.mxu0 %vm97_vm0, %v885_v21  ;;  %592 = vmatmul.msk.f32.gmra.mxu1 %vm97_vm0, %v887_v22 }
  0x2c   :  { %199 = vmatpush.msrb.mxu1 %v174_v23  ;;  %246 = vmatpush.msra.mxu2 %v184_v30  ;;  %v368_v30 = vld [vmem:[#allocation8 + $0xe8] sm:$0xff] }
  0x2e   :  { %200 = vmatpush.msrb.mxu1 %v173_v25  ;;  %247 = vmatpush.msra.mxu2 %v183_v34  ;;  %v366_v34 = vld [vmem:[#allocation8 + $0xd8] sm:$0xff] }
  0x30   :  { %201 = vmatpush.msrb.mxu1 %v172_v27  ;;  %248 = vmatpush.msra.mxu2 %v182_v36  ;;  %v363_v36 = vld [vmem:[#allocation8 + $0xc0] sm:$0xff] }
  0x32   :  { %202 = vmatpush.msrb.mxu1 %v171_v29  ;;  %249 = vmatpush.msra.mxu2 %v181_v38  ;;  %v369_v29 = vld [vmem:[#allocation8 + $0xf0] sm:$0xff] }
  0x33   :  { %589 = vmatmul.msk.f32.gmra.mxu0 %vm97_vm0, %v893_v31  ;;  %593 = vmatmul.msk.f32.gmra.mxu1 %vm97_vm0, %v895_v32  ;;  %v361_v38 = vld [vmem:[#allocation8 + $0xb0] sm:$0xff] }
  0x34   :  { %203 = vmatpush.msrb.mxu1 %v170_v33  ;;  %250 = vmatpush.msra.mxu2 %v180_v40  ;;  %v367_v33 = vld [vmem:[#allocation8 + $0xe0] sm:$0xff]  ;;  %v357_v40 = vld [vmem:[#allocation8 + $0x90] sm:$0xff] }
  0x36   :  { %204 = vmatpush.msrb.mxu1 %v169_v35  ;;  %251 = vmatpush.msra.mxu2 %v179_v44  ;;  %v365_v35 = vld [vmem:[#allocation8 + $0xd0] sm:$0xff] }
  0x37   :  { %252 = vmatmul.f32.vlgmr.msra.gmra.mxu2 %v871_v10 }
  0x38   :  { %205 = vmatpush.msrb.mxu1 %v168_v37  ;;  %v362_v37 = vld [vmem:[#allocation8 + $0xb8] sm:$0xff] }
  0x3a   :  { %206 = vmatpush.msrb.mxu1 %v167_v39  ;;  %v359_v39 = vld [vmem:[#allocation8 + $0xa0] sm:$0xff] }
  0x3b   :  { %590 = vmatmul.msk.f32.gmra.mxu0 %vm97_vm0, %v901_v41  ;;  %594 = vmatmul.msk.f32.gmra.mxu1 %vm97_vm0, %v903_v42 }
  0x3c   :  { %207 = vmatpush.msrb.mxu1 %v166_v43  ;;  %v356_v43 = vld [vmem:[#allocation8 + $0x88] sm:$0xff] }
  0x3e   :  { %208 = vmatpush.msrb.mxu1 %v165_v45 }
  0x3f   :  { %255 = vmatmul.f32.gmra.mxu2 %v867_v8 }
  0x40   :  { %209 = vmatpush.msrb.mxu1 %v164_v46 }
  0x42   :  { %210 = vmatpush.msrb.mxu1 %v163_v47 }
  0x47   :  { %258 = vmatmul.f32.gmra.mxu2 %v863_v5 }
  0x4f   :  { %261 = vmatmul.f32.gmra.mxu2 %v859_v4 }
  0x57   :  { %264 = vmatmul.f32.gmra.mxu2 %v855_v3 }
  0x5f   :  { %267 = vmatmul.f32.gmra.mxu2 %v851_v2 }
  0x67   :  { %270 = vmatmul.f32.gmra.mxu2 %v847_v1 }
  0x6f   :  { %273 = vmatmul.f32.gmra.mxu2 %v845_v0 }
  0xa0   :  { %v139_v48 = vpop.f32.mrf.mxu0  ;;  %v151_v52 = vpop.f32.mrf.mxu1 }
  0xa1   :  { %211 = vmatmul.f32.vlgmr.msrb.gmra.mxu1 %v139_v48 }
  0xa8   :  { %v142_v49 = vpop.f32.mrf.mxu0  ;;  %v154_v53 = vpop.f32.mrf.mxu1 }
  0xa9   :  { %214 = vmatmul.f32.gmra.mxu1 %v142_v49  ;;  %v354_v49 = vld [vmem:[#allocation8 + $0x78] sm:$0xff] }
  0xaa   :  { %371 = vmatpush.msrb.mxu0 %v354_v49 }
  0xb0   :  { %v145_v50 = vpop.f32.mrf.mxu0  ;;  %v157_v54 = vpop.f32.mrf.mxu1 }
  0xb1   :  { %217 = vmatmul.f32.gmra.mxu1 %v145_v50  ;;  %v353_v50 = vld [vmem:[#allocation8 + $0x70] sm:$0xff] }
  0xb2   :  { %372 = vmatpush.msrb.mxu0 %v353_v50 }
  0xb8   :  { %v148_v51 = vpop.f32.mrf.mxu0  ;;  %v160_v55 = vpop.f32.mrf.mxu1 }
  0xb9   :  { %220 = vmatmul.f32.gmra.mxu1 %v148_v51  ;;  %v352_v51 = vld [vmem:[#allocation8 + $0x68] sm:$0xff] }
  0xba   :  { %v253_v56 = vpop.f32.mrf.mxu2  ;;  %373 = vmatpush.msrb.mxu0 %v352_v51 }
  0xc1   :  { %223 = vmatmul.f32.gmra.mxu1 %v151_v52  ;;  %v351_v52 = vld [vmem:[#allocation8 + $0x60] sm:$0xff] }
  0xc2   :  { %v256_v57 = vpop.f32.mrf.mxu2  ;;  %374 = vmatpush.msrb.mxu0 %v351_v52 }
  0xc9   :  { %226 = vmatmul.f32.gmra.mxu1 %v154_v53  ;;  %v350_v53 = vld [vmem:[#allocation8 + $0x58] sm:$0xff] }
  0xca   :  { %v259_v60 = vpop.f32.mrf.mxu2  ;;  %375 = vmatpush.msrb.mxu0 %v350_v53 }
  0xd1   :  { %229 = vmatmul.f32.gmra.mxu1 %v157_v54  ;;  %v349_v54 = vld [vmem:[#allocation8 + $0x50] sm:$0xff] }
  0xd2   :  { %v262_v62 = vpop.f32.mrf.mxu2  ;;  %376 = vmatpush.msrb.mxu0 %v349_v54 }
  0xd9   :  { %232 = vmatmul.f32.gmra.mxu1 %v160_v55  ;;  %v348_v55 = vld [vmem:[#allocation8 + $0x48] sm:$0xff] }
  0xda   :  { %v265_v1 = vpop.f32.mrf.mxu2  ;;  %377 = vmatpush.msrb.mxu0 %v348_v55 }
  0xe2   :  { %v268_v3 = vpop.f32.mrf.mxu2 }
  0xea   :  { %v271_v5 = vpop.f32.mrf.mxu2 }
  0xf2   :  { %v274_v7 = vpop.f32.mrf.mxu2 }
 0x11e   :  { %v212_v58 = vpop.f32.mrf.mxu1 }
 0x11f   :  { %v254_v59 = vadd.f32 %v253_v56, %v212_v58  ;;  %v347_v56 = vld [vmem:[#allocation8 + $0x40] sm:$0xff]  ;;  %v346_v58 = vld [vmem:[#allocation8 + $0x38] sm:$0xff] }
 0x120   :  { %378 = vmatpush.msrb.mxu0 %v347_v56 }
 0x121   :  { %v277_v27 = vmax.f32 %v254_v59, 0.0  ;;  %v345_v59 = vld [vmem:[#allocation8 + $0x30] sm:$0xff] }
 0x122   :  { %379 = vmatpush.msrb.mxu0 %v346_v58 }
 0x124   :  { %380 = vmatpush.msrb.mxu0 %v345_v59 }
 0x126   :  { %v215_v61 = vpop.f32.mrf.mxu1 }
 0x127   :  { %v257_v23 = vadd.f32 %v256_v57, %v215_v61  ;;  %v343_v61 = vld [vmem:[#allocation8 + $0x20] sm:$0xff] }
 0x129   :  { %v278_v26 = vmax.f32 %v257_v23, 0.0 }
 0x12e   :  { %v218_v63 = vpop.f32.mrf.mxu1 }
 0x12f   :  { %v260_v19 = vadd.f32 %v259_v60, %v218_v63  ;;  %v344_v60 = vld [vmem:[#allocation8 + $0x28] sm:$0xff]  ;;  %v342_v63 = vld [vmem:[#allocation8 + $0x18] sm:$0xff] }
 0x130   :  { %381 = vmatpush.msrb.mxu0 %v344_v60 }
 0x131   :  { %v279_v25 = vmax.f32 %v260_v19, 0.0 }
 0x132   :  { %382 = vmatpush.msrb.mxu0 %v343_v61 }
 0x134   :  { %383 = vmatpush.msrb.mxu0 %v342_v63 }
 0x136   :  { %v221_v0 = vpop.f32.mrf.mxu1 }
 0x137   :  { %v263_v17 = vadd.f32 %v262_v62, %v221_v0  ;;  %v341_v0 = vld [vmem:[#allocation8 + $0x10] sm:$0xff] }
 0x138   :  { %384 = vmatpush.msrb.mxu0 %v341_v0 }
 0x139   :  { %v931_v24 = vmax.f32 %v263_v17, 0.0 }
 0x13e   :  { %v224_v2 = vpop.f32.mrf.mxu1 }
 0x13f   :  { %v266_v15 = vadd.f32 %v265_v1, %v224_v2  ;;  %v340_v1 = vld [vmem:[#allocation8 + $0x8] sm:$0xff] }
 0x140   :  { %385 = vmatpush.msrb.mxu0 %v340_v1 }
 0x141   :  { %v927_v20 = vmax.f32 %v266_v15, 0.0 }
 0x146   :  { %v227_v4 = vpop.f32.mrf.mxu1 }
 0x147   :  { %v269_v13 = vadd.f32 %v268_v3, %v227_v4  ;;  %v339_v3 = vld [vmem:[#allocation8] sm:$0xff] }
 0x148   :  { %386 = vmatpush.msrb.mxu0 %v339_v3 }
 0x149   :  { %v923_v18 = vmax.f32 %v269_v13, 0.0 }
 0x14e   :  { %v230_v6 = vpop.f32.mrf.mxu1 }
 0x14f   :  { %v272_v9 = vadd.f32 %v271_v5, %v230_v6 }
 0x151   :  { %v919_v16 = vmax.f32 %v272_v9, 0.0 }
 0x156   :  { %v233_v8 = vpop.f32.mrf.mxu1 }
 0x157   :  { %v275_v10 = vadd.f32 %v274_v7, %v233_v8 }
 0x159   :  { %v917_v14 = vmax.f32 %v275_v10, 0.0 }
 0x15b   :  { %293 = vmatpush.msrb.mxu2 %v917_v14  ;;  %612 = vmatpush.msra.mxu3 %v917_v14 }
 0x15d   :  { %294 = vmatpush.msrb.mxu2 %v919_v16  ;;  %613 = vmatpush.msra.mxu3 %v919_v16 }
 0x15f   :  { %295 = vmatpush.msrb.mxu2 %v923_v18  ;;  %614 = vmatpush.msra.mxu3 %v923_v18 }
 0x161   :  { %296 = vmatpush.msrb.mxu2 %v927_v20  ;;  %615 = vmatpush.msra.mxu3 %v927_v20 }
 0x163   :  { %297 = vmatpush.msrb.mxu2 %v931_v24  ;;  %616 = vmatpush.msra.mxu3 %v931_v24 }
 0x165   :  { %298 = vmatpush.msrb.mxu2 %v279_v25  ;;  %617 = vmatpush.msra.mxu3 %v279_v25 }
 0x167   :  { %299 = vmatpush.msrb.mxu2 %v278_v26  ;;  %618 = vmatpush.msra.mxu3 %v278_v26 }
 0x169   :  { %300 = vmatpush.msrb.mxu2 %v277_v27  ;;  %619 = vmatpush.msra.mxu3 %v277_v27 }
 0x16a   :  { %595 = vmatmul.msk.f32.vlgmr.msrb.gmra.mxu2 %vm97_vm0, %v874_v11  ;;  %598 = vmatmul.msk.f32.vlgmr.msra.gmra.mxu3 %vm97_vm0, %v901_v41  ;;  %v364_v11 = vld [vmem:[#allocation8 + $0xc8] sm:$0xff]  ;;  %v326_v41 = vlaneseq }
 0x16b   :  { %412 = vmatpush.msrb.mxu3 %v370_v28 }
 0x16c   :  { %v951_v44 = vand.u32 127, %v326_v41 }
 0x16d   :  { %413 = vmatpush.msrb.mxu3 %v369_v29 }
 0x16e   :  { %vm328_vm1 = vcmp.eq.s32.totalorder %v951_v44, 16  ;;  %vm461_vm2 = vcmp.lt.s32.totalorder %v951_v44, 3 }
 0x16f   :  { %414 = vmatpush.msrb.mxu3 %v368_v30 }
 0x171   :  { %415 = vmatpush.msrb.mxu3 %v367_v33 }
 0x172   :  { %596 = vmatmul.msk.f32.gmra.mxu2 %vm97_vm0, %v885_v21  ;;  %599 = vmatmul.msk.f32.gmra.mxu3 %vm97_vm0, %v877_v12  ;;  %v360_v21 = vld [vmem:[#allocation8 + $0xa8] sm:$0xff]  ;;  %v358_v12 = vld [vmem:[#allocation8 + $0x98] sm:$0xff] }
 0x173   :  { %416 = vmatpush.msrb.mxu3 %v366_v34 }
 0x175   :  { %417 = vmatpush.msrb.mxu3 %v365_v35 }
 0x177   :  { %418 = vmatpush.msrb.mxu3 %v364_v11 }
 0x179   :  { %419 = vmatpush.msrb.mxu3 %v363_v36 }
 0x17a   :  { %597 = vmatmul.msk.f32.gmra.mxu2 %vm97_vm0, %v893_v31  ;;  %600 = vmatmul.msk.f32.gmra.mxu3 %vm97_vm0, %v887_v22  ;;  %v355_v31 = vld [vmem:[#allocation8 + $0x80] sm:$0xff]  ;;  %v794_v22 = vmov 0.0  }
 0x17b   :  { %420 = vmatpush.msrb.mxu3 %v362_v37  ;;  %v603_v45 = vsel %vm328_vm1, 1.0, %v794_v22 }
 0x17c   :  { %v331_v46 = vadd.f32 %v603_v45, %v277_v27  ;;  %v333_v47 = vadd.f32 %v603_v45, %v279_v25  ;;  %v334_v48 = vadd.f32 %v603_v45, %v931_v24  ;;  %v336_v57 = vadd.f32 %v603_v45, %v923_v18 }
 0x17d   :  { %421 = vmatpush.msrb.mxu3 %v361_v38  ;;  %v337_v62 = vadd.f32 %v603_v45, %v919_v16  ;;  %v338_v2 = vadd.f32 %v603_v45, %v917_v14 }
 0x17f   :  { %422 = vmatpush.msrb.mxu3 %v360_v21 }
 0x181   :  { %423 = vmatpush.msrb.mxu3 %v359_v39 }
 0x182   :  { %601 = vmatmul.msk.f32.gmra.mxu3 %vm97_vm0, %v895_v32  ;;  %v332_v32 = vadd.f32 %v603_v45, %v278_v26 }
 0x183   :  { %424 = vmatpush.msrb.mxu3 %v358_v12 }
 0x185   :  { %425 = vmatpush.msrb.mxu3 %v357_v40 }
 0x187   :  { %426 = vmatpush.msrb.mxu3 %v356_v43 }
 0x189   :  { %427 = vmatpush.msrb.mxu3 %v355_v31 }
 0x18a   :  { %602 = vmatmul.msk.f32.gmra.mxu3 %vm97_vm0, %v903_v42  ;;  %v335_v42 = vadd.f32 %v603_v45, %v927_v20 }
 0x192   :  { %428 = vmatmul.f32.vlgmr.msrb.gmra.mxu3 %v331_v46 }
 0x19a   :  { %431 = vmatmul.f32.gmra.mxu3 %v332_v32 }
 0x1a2   :  { %434 = vmatmul.f32.gmra.mxu3 %v333_v47 }
 0x1aa   :  { %437 = vmatmul.f32.gmra.mxu3 %v334_v48 }
 0x1b2   :  { %440 = vmatmul.f32.gmra.mxu3 %v335_v42 }
 0x1ba   :  { %443 = vmatmul.f32.gmra.mxu3 %v336_v57 }
 0x1c2   :  { %446 = vmatmul.f32.gmra.mxu3 %v337_v62 }
 0x1ca   :  { %449 = vmatmul.f32.gmra.mxu3 %v338_v2 }
 0x1ed   :  { %v302_v4 = vpop.f32.mrf.mxu2  ;;  %v311_v6 = vpop.f32.mrf.mxu3 }
 0x1ee   :  { %387 = vmatmul.f32.vlgmr.msrb.gmra.mxu0 %v302_v4 }
 0x1f5   :  { %v305_v5 = vpop.f32.mrf.mxu2  ;;  %v314_v8 = vpop.f32.mrf.mxu3 }
 0x1f6   :  { %390 = vmatmul.f32.gmra.mxu0 %v305_v5 }
 0x1fd   :  { %v308_v7 = vpop.f32.mrf.mxu2  ;;  %v317_v9 = vpop.f32.mrf.mxu3 }
 0x1fe   :  { %393 = vmatmul.f32.gmra.mxu0 %v308_v7 }
 0x205   :  { %v320_v10 = vpop.f32.mrf.mxu3 }
 0x206   :  { %396 = vmatmul.f32.gmra.mxu0 %v311_v6 }
 0x20d   :  { %v323_v13 = vpop.f32.mrf.mxu3 }
 0x20e   :  { %399 = vmatmul.f32.gmra.mxu0 %v314_v8 }
 0x215   :  { %v429_v14 = vpop.f32.mrf.mxu3 }
 0x216   :  { %402 = vmatmul.f32.gmra.mxu0 %v317_v9 }
 0x21d   :  { %v432_v15 = vpop.f32.mrf.mxu3 }
 0x21e   :  { %405 = vmatmul.f32.gmra.mxu0 %v320_v10 }
 0x225   :  { %v435_v20 = vpop.f32.mrf.mxu3 }
 0x226   :  { %408 = vmatmul.f32.gmra.mxu0 %v323_v13 }
 0x22d   :  { %v438_v27 = vpop.f32.mrf.mxu3 }
 0x235   :  { %v441_v11 = vpop.f32.mrf.mxu3 }
 0x23d   :  { %v444_v12 = vpop.f32.mrf.mxu3 }
 0x245   :  { %v447_v45 = vpop.f32.mrf.mxu3 }
 0x24d   :  { %v450_v49 = vpop.f32.mrf.mxu3 }
 0x26b   :  { %v388_v16 = vpop.f32.mrf.mxu0 }
 0x26c   :  { %v430_v17 = vadd.f32 %v429_v14, %v388_v16 }
 0x26e   :  { %v453_v18 = vmax.f32 %v430_v17, 0.0 }
 0x270   :  { %v462_v19 = vsel %vm461_vm2, %v453_v18, -1e+30 }
 0x271   :  { %470 = vmax.xlane.f32.xlu0 %v462_v19 }
 0x273   :  { %v391_v23 = vpop.f32.mrf.mxu0 }
 0x274   :  { %v433_v24 = vadd.f32 %v432_v15, %v391_v23 }
 0x276   :  { %v454_v25 = vmax.f32 %v433_v24, 0.0 }
 0x278   :  { %v463_v26 = vsel %vm461_vm2, %v454_v25, -1e+30 }
 0x279   :  { %472 = vmax.xlane.f32.xlu0 %v463_v26 }
 0x27b   :  { %v394_v28 = vpop.f32.mrf.mxu0 }
 0x27c   :  { %v436_v29 = vadd.f32 %v435_v20, %v394_v28 }
 0x27e   :  { %v455_v30 = vmax.f32 %v436_v29, 0.0 }
 0x280   :  { %v464_v33 = vsel %vm461_vm2, %v455_v30, -1e+30 }
 0x281   :  { %474 = vmax.xlane.f32.xlu1 %v464_v33 }
 0x283   :  { %v397_v34 = vpop.f32.mrf.mxu0 }
 0x284   :  { %v439_v35 = vadd.f32 %v438_v27, %v397_v34 }
 0x286   :  { %v456_v36 = vmax.f32 %v439_v35, 0.0 }
 0x288   :  { %v465_v37 = vsel %vm461_vm2, %v456_v36, -1e+30 }
 0x289   :  { %476 = vmax.xlane.f32.xlu1 %v465_v37 }
 0x28b   :  { %v400_v38 = vpop.f32.mrf.mxu0 }
 0x28c   :  { %v442_v21 = vadd.f32 %v441_v11, %v400_v38 }
 0x28e   :  { %v457_v39 = vmax.f32 %v442_v21, 0.0 }
 0x290   :  { %v466_v40 = vsel %vm461_vm2, %v457_v39, -1e+30 }
 0x291   :  { %478 = vmax.xlane.f32.xlu2 %v466_v40 }
 0x293   :  { %v403_v41 = vpop.f32.mrf.mxu0 }
 0x294   :  { %v445_v43 = vadd.f32 %v444_v12, %v403_v41 }
 0x296   :  { %v458_v31 = vmax.f32 %v445_v43, 0.0 }
 0x298   :  { %v467_v22 = vsel %vm461_vm2, %v458_v31, -1e+30 }
 0x299   :  { %480 = vmax.xlane.f32.xlu2 %v467_v22 }
 0x29b   :  { %v406_v46 = vpop.f32.mrf.mxu0 }
 0x29c   :  { %v448_v32 = vadd.f32 %v447_v45, %v406_v46 }
 0x29e   :  { %v459_v47 = vmax.f32 %v448_v32, 0.0 }
 0x2a0   :  { %v468_v48 = vsel %vm461_vm2, %v459_v47, -1e+30 }
 0x2a1   :  { %482 = vmax.xlane.f32.xlu0 %v468_v48 }
 0x2a3   :  { %v409_v50 = vpop.f32.mrf.mxu0 }
 0x2a4   :  { %v451_v51 = vadd.f32 %v450_v49, %v409_v50 }
 0x2a6   :  { %v460_v52 = vmax.f32 %v451_v51, 0.0 }
 0x2a8   :  { %v469_v42 = vsel %vm461_vm2, %v460_v52, -1e+30 }
 0x2a9   :  { %484 = vmax.xlane.f32.xlu1 %v469_v42 }
 0x2e4   :  { %v471_v53 = vpop.xlane.xlu0 %470 }
 0x2e5   :  { %v486_v54 = vsub.f32 %v462_v19, %v471_v53 }
 0x2e7   :  { %v494_v55 = vmul.f32 1.442695, %v486_v54 }
 0x2e9   :  { %628 = vpow2.f32 %v494_v55 }
 0x2ec   :  { %v473_v56 = vpop.xlane.xlu0 %472 }
 0x2ed   :  { %v487_v57 = vsub.f32 %v463_v26, %v473_v56 }
 0x2ef   :  { %v629_v58 = vpop.eup %628  ;;  %v496_v59 = vmul.f32 1.442695, %v487_v57 }
 0x2f0   :  { %510 = vadd.xlane.f32.xlu2 %v629_v58 }
 0x2f1   :  { %630 = vpow2.f32 %v496_v59 }
 0x2f4   :  { %v475_v60 = vpop.xlane.xlu1 %474 }
 0x2f5   :  { %v488_v61 = vsub.f32 %v464_v33, %v475_v60 }
 0x2f7   :  { %v631_v62 = vpop.eup %630  ;;  %v498_v63 = vmul.f32 1.442695, %v488_v61 }
 0x2f8   :  { %512 = vadd.xlane.f32.xlu0 %v631_v62 }
 0x2f9   :  { %632 = vpow2.f32 %v498_v63 }
 0x2fc   :  { %v477_v0 = vpop.xlane.xlu1 %476 }
 0x2fd   :  { %v489_v1 = vsub.f32 %v465_v37, %v477_v0 }
 0x2ff   :  { %v633_v2 = vpop.eup %632  ;;  %v500_v3 = vmul.f32 1.442695, %v489_v1 }
 0x300   :  { %514 = vadd.xlane.f32.xlu1 %v633_v2 }
 0x301   :  { %634 = vpow2.f32 %v500_v3 }
 0x304   :  { %v479_v4 = vpop.xlane.xlu2 %478 }
 0x305   :  { %v490_v5 = vsub.f32 %v466_v40, %v479_v4 }
 0x307   :  { %v635_v6 = vpop.eup %634  ;;  %v502_v7 = vmul.f32 1.442695, %v490_v5 }
 0x308   :  { %516 = vadd.xlane.f32.xlu2 %v635_v6 }
 0x309   :  { %636 = vpow2.f32 %v502_v7 }
 0x30c   :  { %v481_v8 = vpop.xlane.xlu2 %480 }
 0x30d   :  { %v491_v9 = vsub.f32 %v467_v22, %v481_v8 }
 0x30f   :  { %v637_v10 = vpop.eup %636  ;;  %v504_v13 = vmul.f32 1.442695, %v491_v9 }
 0x310   :  { %518 = vadd.xlane.f32.xlu0 %v637_v10 }
 0x311   :  { %638 = vpow2.f32 %v504_v13 }
 0x314   :  { %v483_v14 = vpop.xlane.xlu0 %482 }
 0x315   :  { %v978_v15 = vsub.f32 %v468_v48, %v483_v14 }
 0x317   :  { %v639_v16 = vpop.eup %638  ;;  %v506_v17 = vmul.f32 1.442695, %v978_v15 }
 0x318   :  { %520 = vadd.xlane.f32.xlu1 %v639_v16 }
 0x319   :  { %640 = vpow2.f32 %v506_v17 }
 0x31c   :  { %v485_v18 = vpop.xlane.xlu1 %484 }
 0x31d   :  { %v981_v19 = vsub.f32 %v469_v42, %v485_v18 }
 0x31f   :  { %v641_v20 = vpop.eup %640  ;;  %v508_v23 = vmul.f32 1.442695, %v981_v19 }
 0x320   :  { %522 = vadd.xlane.f32.xlu2 %v641_v20 }
 0x321   :  { %642 = vpow2.f32 %v508_v23 }
 0x327   :  { %v643_v24 = vpop.eup %642 }
 0x328   :  { %524 = vadd.xlane.f32.xlu0 %v643_v24 }
 0x363   :  { %v511_v25 = vpop.xlane.xlu2 %510 }
 0x364   :  { %644 = vlog2.f32 %v511_v25 }
 0x36a   :  { %v645_v26 = vpop.eup %644 }
 0x36b   :  { %v527_v27 = vmul.f32 0.6931472, %v645_v26  ;;  %v513_v28 = vpop.xlane.xlu0 %512 }
 0x36c   :  { %646 = vlog2.f32 %v513_v28 }
 0x36d   :  { %v542_v29 = vsub.f32 %v486_v54, %v527_v27 }
 0x36f   :  { %v550_v30 = vsel %vm461_vm2, %v542_v29, 0.0 }
 0x370   :  { %558 = vst [vmem:[#allocation10] sm:$0xff] %v550_v30 }
 0x372   :  { %v647_v33 = vpop.eup %646 }
 0x373   :  { %v529_v34 = vmul.f32 0.6931472, %v647_v33  ;;  %v515_v35 = vpop.xlane.xlu1 %514 }
 0x374   :  { %648 = vlog2.f32 %v515_v35 }
 0x375   :  { %v543_v11 = vsub.f32 %v487_v57, %v529_v34 }
 0x377   :  { %v551_v36 = vsel %vm461_vm2, %v543_v11, 0.0 }
 0x378   :  { %559 = vst [vmem:[#allocation10 + $0x8] sm:$0xff] %v551_v36 }
 0x37a   :  { %v649_v37 = vpop.eup %648 }
 0x37b   :  { %v531_v38 = vmul.f32 0.6931472, %v649_v37  ;;  %v517_v21 = vpop.xlane.xlu2 %516 }
 0x37c   :  { %650 = vlog2.f32 %v517_v21 }
 0x37d   :  { %v544_v39 = vsub.f32 %v488_v61, %v531_v38 }
 0x37f   :  { %v552_v12 = vsel %vm461_vm2, %v544_v39, 0.0 }
 0x380   :  { %560 = vst [vmem:[#allocation10 + $0x10] sm:$0xff] %v552_v12 }
 0x382   :  { %v651_v40 = vpop.eup %650 }
 0x383   :  { %v533_v41 = vmul.f32 0.6931472, %v651_v40  ;;  %v519_v43 = vpop.xlane.xlu0 %518 }
 0x384   :  { %652 = vlog2.f32 %v519_v43 }
 0x385   :  { %v545_v31 = vsub.f32 %v489_v1, %v533_v41 }
 0x387   :  { %v553_v22 = vsel %vm461_vm2, %v545_v31, 0.0 }
 0x388   :  { %561 = vst [vmem:[#allocation10 + $0x18] sm:$0xff] %v553_v22 }
 0x38a   :  { %v653_v45 = vpop.eup %652 }
 0x38b   :  { %v535_v46 = vmul.f32 0.6931472, %v653_v45  ;;  %v521_v32 = vpop.xlane.xlu1 %520 }
 0x38c   :  { %654 = vlog2.f32 %v521_v32 }
 0x38d   :  { %v546_v47 = vsub.f32 %v490_v5, %v535_v46 }
 0x38f   :  { %v554_v48 = vsel %vm461_vm2, %v546_v47, 0.0 }
 0x390   :  { %562 = vst [vmem:[#allocation10 + $0x20] sm:$0xff] %v554_v48 }
 0x392   :  { %v655_v49 = vpop.eup %654 }
 0x393   :  { %v537_v50 = vmul.f32 0.6931472, %v655_v49  ;;  %v523_v51 = vpop.xlane.xlu2 %522 }
 0x394   :  { %656 = vlog2.f32 %v523_v51 }
 0x395   :  { %v547_v52 = vsub.f32 %v491_v9, %v537_v50 }
 0x397   :  { %v555_v42 = vsel %vm461_vm2, %v547_v52, 0.0 }
 0x398   :  { %563 = vst [vmem:[#allocation10 + $0x28] sm:$0xff] %v555_v42 }
 0x39a   :  { %v657_v53 = vpop.eup %656 }
 0x39b   :  { %v539_v54 = vmul.f32 0.6931472, %v657_v53  ;;  %v525_v55 = vpop.xlane.xlu0 %524 }
 0x39c   :  { %658 = vlog2.f32 %v525_v55 }
 0x39d   :  { %v548_v56 = vsub.f32 %v978_v15, %v539_v54 }
 0x39f   :  { %v556_v57 = vsel %vm461_vm2, %v548_v56, 0.0 }
 0x3a0   :  { %564 = vst [vmem:[#allocation10 + $0x30] sm:$0xff] %v556_v57 }
 0x3a2   :  { %v659_v58 = vpop.eup %658 }
 0x3a3   :  { %v541_v59 = vmul.f32 0.6931472, %v659_v58 }
 0x3a5   :  { %v549_v60 = vsub.f32 %v981_v19, %v541_v59 }
 0x3a7   :  { %v557_v61 = vsel %vm461_vm2, %v549_v60, 0.0 }
 0x3a8   :  { %565 = vst [vmem:[#allocation10 + $0x38] sm:$0xff] %v557_v61 }
 0x3a9   :  { %578 = dma.vmem_to_hbm [thread:$0]  %s571_s8, 1024, %s573_s11, [#allocation4], %s789_s23, %s789_s23, %s790_s24  }
 0x3aa   :  { %786 = dma.done.wait [#allocation4], 1024  }
 0x3ab   :  { %787 = vsyncadd [#allocation4], 4294966272 }
 0x3ac   :  { %583 = vsyncpa [#allocation3], 1 }
 0x3ad   :  { %584 = vsyncpa [#allocation6], 1 }
 0x3ae   :  { %585 = vsyncpa [#allocation9], 1 }
 0x3af   :  { %586 = vsyncpa [#allocation4], 1 }

</bundles_post_ra>
